<compile_context>
chip_gen: v7x
topology: tpu7x:2x2x1
jax: 0.10.0
libtpu: 0.0.40
codegen_flags: <defaults>
</compile_context>

<pallas_src>
import functools

import jax
import jax.numpy as jnp
from jax.experimental import pallas as pl
from jax.experimental.pallas import tpu as pltpu

INPUT_DIM = 16
LATENT_DIM = 2
BATCH = 8


# ----------------------------------------------------------------------------
# Static parameter-slab layout (rows, 128 lanes).
#   * MXU-fed weight blocks start on 8-row boundaries.
#   * Tiny row-addressed weights + all bias rows live in one compact region
#     (different sublanes of shared tiles) -> less zero padding in the DMA.
#   * whead is placed at lane offset INPUT_DIM and w7 at lane offset 0 so the
#     head / recon matmul results are already at their final output lanes.
# ----------------------------------------------------------------------------
def _make_layout(input_dim, latent_dim):
    I = input_dim
    L2 = 2 * latent_dim
    L4 = 4 * latent_dim
    assert I <= 128 and I + L4 + 1 <= 128

    layout = {}
    row = 0

    def add(name, nrows, ncols, col=0, align=1):
        nonlocal row
        assert col + ncols <= 128
        layout[name] = (row, nrows, col, ncols)
        row += ((nrows + align - 1) // align) * align

    # ---- MXU-fed weight blocks (8-row aligned) ----
    add("w1", I, 128, align=8)
    add("w2", 128, 64, align=8)
    add("whead", 64, L4, col=I, align=8)   # fused [mu1|mu2|lv1|lv2], at output lanes
    add("wa2", 64, L2, align=8)            # attn Linear(64, 2L)
    add("w6", 64, 128, align=8)
    add("w7", 128, I, align=8)             # fc7 -> recon at output lanes [0, I)
    # ---- compact row-addressed region (tiny-K weights + all biases) ----
    add("wa1", L2, 64)                     # attn Linear(2L, 64)   (VPU FMA)
    add("w5x1", L2, 96)                    # fused [fc5 | aux1]    (VPU FMA)
    add("wx2t", 1, 32)                     # aux Linear(32,1), stored transposed
    add("b1", 1, 128)
    add("b2", 1, 64)
    add("bhead", 1, L4, col=I)
    add("ba1", 1, 64)
    add("ba2", 1, L2)
    add("b5x1", 1, 96)
    add("bx2", 1, 1)
    add("b6", 1, 128)
    add("b7", 1, I)

    total_rows = ((row + 15) // 16) * 16   # tidy bf16 (16,128) tile multiple
    return layout, total_rows


# ----------------------------------------------------------------------------
# Kernel
# ----------------------------------------------------------------------------
def _hicvae_kernel(layout, input_dim, latent_dim, xe_ref, slab_ref, out_ref):
    f32, bf16 = jnp.float32, jnp.bfloat16
    B = xe_ref.shape[0]
    I = input_dim
    L2, L4 = 2 * latent_dim, 4 * latent_dim

    def wfull(name):                 # weight block, all 128 lanes (zeros elsewhere)
        r, nr, _, _ = layout[name]
        return slab_ref[r:r + nr, :]

    def wblk(name):                  # weight block restricted to its own columns
        r, nr, c, nc = layout[name]
        return slab_ref[r:r + nr, c:c + nc]

    def brow(name, k=0, full=False):  # one bias / tiny-weight row, cast to f32
        r, _, c, nc = layout[name]
        if full:
            return slab_ref[r + k:r + k + 1, :].astype(f32)
        return slab_ref[r + k:r + k + 1, c:c + nc].astype(f32)

    def sigmoid(v):                  # explicit form -> guaranteed EUP lowering
        return 1.0 / (1.0 + jnp.exp(-v))

    xe = xe_ref[...]                                   # (B, I + 2L) f32
    x, eps = xe[:, :I], xe[:, I:I + L2]                # eps = [eps1 | eps2]

    # ---------------- encoder: bf16 MXU matmuls, f32 accumulation --------------
    h = jnp.maximum(jnp.dot(x.astype(bf16), wblk("w1"),
                            preferred_element_type=f32) + brow("b1"), 0.0)
    h = jnp.maximum(jnp.dot(h.astype(bf16), wblk("w2"),
                            preferred_element_type=f32) + brow("b2"), 0.0)

    # fused latent head [mu1|mu2|lv1|lv2], produced directly at lanes [I, I+4L)
    head = jnp.dot(h.astype(bf16), wfull("whead"),
                   preferred_element_type=f32) + brow("bhead", full=True)   # (B, 128)
    mu = head[:, I:I + L2]
    lv = head[:, I + L2:I + L4]

    # reparameterize: z = mu + eps * exp(0.5 * logvar)      (z = [z1 | z2])
    z = mu + eps * jnp.exp(0.5 * lv)                                        # (B, 2L)

    # ---------------- attention gate --------------------------------------------
    # Linear(2L, 64): K is tiny -> VPU broadcast-FMA (no extra MXU round trip).
    # TODO(synk): if the bundle dump shows the per-k lane broadcasts hitting the
    # XLU hard, revert this (and the fused fc5|aux1 loop) to one padded MXU dot.
    a = brow("ba1")
    for k in range(L2):
        a = a + z[:, k:k + 1] * brow("wa1", k)
    a = jnp.maximum(a, 0.0)
    gate = sigmoid(jnp.dot(a.astype(bf16), wblk("wa2"),
                           preferred_element_type=f32) + brow("ba2"))
    zg = z * gate                                                           # gated z

    # ------- fused fc5 | aux-1 (2L -> 96): single broadcast-FMA accumulator -----
    dax = brow("b5x1")
    for k in range(L2):
        dax = dax + zg[:, k:k + 1] * brow("w5x1", k)
    dax = jnp.maximum(dax, 0.0)
    d = dax[:, :64]                                                         # fc5 out
    ax = dax[:, 64:96]                                                      # aux1 out

    # aux-2 Linear(32, 1): lane multiply + reduce (VPU/XLU), then batch mean
    aux = sigmoid(jnp.sum(ax * brow("wx2t"), axis=-1, keepdims=True) + brow("bx2"))
    klw = jnp.sum(aux, axis=0, keepdims=True) * (1.0 / B)                   # (1, 1)

    # ---------------- decoder tail ----------------------------------------------
    d = jnp.maximum(jnp.dot(d.astype(bf16), wblk("w6"),
                            preferred_element_type=f32) + brow("b6"), 0.0)
    recon = sigmoid(jnp.dot(d.astype(bf16), wfull("w7"),
                            preferred_element_type=f32) + brow("b7", full=True))  # (B,128)

    # -------- build the (B, 128) output tile in registers, ONE unmasked store ---
    lane = jax.lax.broadcasted_iota(jnp.int32, (B, 128), 1)
    out = jnp.where(lane < I, recon, 0.0)              # recon at lanes [0, I)
    out = out + head                                   # head at lanes [I, I+4L), 0 elsewhere
    out = out + jnp.where(lane == I + L4,
                          jnp.broadcast_to(klw, (B, 128)), 0.0)   # kl weight at lane I+4L
    out_ref[...] = out


# ----------------------------------------------------------------------------
# Parameter init / packing (done once, off the per-call hot path)
# ----------------------------------------------------------------------------
def _linear_params(key, fan_in, fan_out):
    """Deterministic PyTorch-style nn.Linear init; stored as (in, out) / (1, out)."""
    kw, kb = jax.random.split(key)
    bound = 1.0 / jnp.sqrt(jnp.float32(fan_in))
    w = jax.random.uniform(kw, (fan_in, fan_out), jnp.float32, -bound, bound)
    b = jax.random.uniform(kb, (1, fan_out), jnp.float32, -bound, bound)
    return w, b


def init_hicvae_params(key, input_dim, latent_dim):
    keys = jax.random.split(key, 13)
    p = {}
    p["fc1"] = _linear_params(keys[0], input_dim, 128)
    p["fc2"] = _linear_params(keys[1], 128, 64)
    p["fc3_mu1"] = _linear_params(keys[2], 64, latent_dim)
    p["fc3_logvar1"] = _linear_params(keys[3], 64, latent_dim)
    p["fc4_mu2"] = _linear_params(keys[4], 64, latent_dim)
    p["fc4_logvar2"] = _linear_params(keys[5], 64, latent_dim)
    p["attn1"] = _linear_params(keys[6], latent_dim * 2, 64)
    p["attn2"] = _linear_params(keys[7], 64, latent_dim * 2)
    p["aux1"] = _linear_params(keys[8], latent_dim * 2, 32)
    p["aux2"] = _linear_params(keys[9], 32, 1)
    p["fc5"] = _linear_params(keys[10], latent_dim * 2, 64)
    p["fc6"] = _linear_params(keys[11], 64, 128)
    p["fc7"] = _linear_params(keys[12], 128, input_dim)
    return p


def prepare_param_slab(params, input_dim, latent_dim):
    """Pack every weight/bias into one (rows, 128) bf16 slab.  Call once at init."""
    layout, total_rows = _make_layout(input_dim, latent_dim)

    whead = jnp.concatenate([params["fc3_mu1"][0], params["fc4_mu2"][0],
                             params["fc3_logvar1"][0], params["fc4_logvar2"][0]], axis=1)
    bhead = jnp.concatenate([params["fc3_mu1"][1], params["fc4_mu2"][1],
                             params["fc3_logvar1"][1], params["fc4_logvar2"][1]], axis=1)
    w5x1 = jnp.concatenate([params["fc5"][0], params["aux1"][0]], axis=1)   # (2L, 96)
    b5x1 = jnp.concatenate([params["fc5"][1], params["aux1"][1]], axis=1)   # (1, 96)

    entries = {
        "w1": params["fc1"][0], "b1": params["fc1"][1],
        "w2": params["fc2"][0], "b2": params["fc2"][1],
        "whead": whead, "bhead": bhead,
        "wa1": params["attn1"][0], "ba1": params["attn1"][1],
        "wa2": params["attn2"][0], "ba2": params["attn2"][1],
        "w5x1": w5x1, "b5x1": b5x1,
        "wx2t": params["aux2"][0].T, "bx2": params["aux2"][1],
        "w6": params["fc6"][0], "b6": params["fc6"][1],
        "w7": params["fc7"][0], "b7": params["fc7"][1],
    }

    slab = jnp.zeros((total_rows, 128), jnp.bfloat16)
    for name, arr in entries.items():
        r, nr, c, nc = layout[name]
        arr = jnp.asarray(arr, jnp.float32)
        assert arr.shape == (nr, nc), (name, arr.shape, (nr, nc))
        slab = slab.at[r:r + nr, c:c + nc].set(arr.astype(jnp.bfloat16))
    return slab


# ----------------------------------------------------------------------------
# Forward wrapper
# ----------------------------------------------------------------------------
@functools.partial(jax.jit, static_argnames=("input_dim", "latent_dim"))
def hicvae_forward(param_slab, x, eps1, eps2, input_dim=INPUT_DIM, latent_dim=LATENT_DIM):
    layout, total_rows = _make_layout(input_dim, latent_dim)
    assert param_slab.shape == (total_rows, 128) and param_slab.dtype == jnp.bfloat16
    B = x.shape[0]
    I, L = input_dim, latent_dim

    # One fused (B, I + 2L) activation operand -> a single input DMA.
    xe = jnp.concatenate([x, eps1, eps2], axis=1).astype(jnp.float32)

    vmem = pl.BlockSpec(memory_space=pltpu.MemorySpace.VMEM)
    kernel = functools.partial(_hicvae_kernel, layout, input_dim, latent_dim)

    # Single invocation (no grid): at B=8 everything fits easily in VMEM.
    # TODO(synk): for large batches, grid over batch tiles (128 rows on v5e,
    # 256 on v6e/v7x), dimension_semantics=("parallel",), a constant
    # index_map (lambda i: (0, 0)) for the resident weight slab, and a
    # cross-tile reduction for kl_w (per-tile partial sums reduced outside).
    out = pl.pallas_call(
        kernel,
        out_shape=jax.ShapeDtypeStruct((B, 128), jnp.float32),
        in_specs=[vmem, vmem],
        out_specs=vmem,
    )(xe, param_slab)

    recon = out[:, :I]
    mu1 = out[:, I:I + L]
    mu2 = out[:, I + L:I + 2 * L]
    logvar1 = out[:, I + 2 * L:I + 3 * L]
    logvar2 = out[:, I + 3 * L:I + 4 * L]
    kl_w = out[0, I + 4 * L]
    return recon, mu1, logvar1, mu2, logvar2, kl_w


# ----------------------------------------------------------------------------
# Pure-JAX references (mirror the PyTorch forward) for validation
# ----------------------------------------------------------------------------
def hicvae_reference(params, x, eps1, eps2, mirror_kernel_precision=False):
    """mirror_kernel_precision=True reproduces the kernel's numerics
    (bf16 weights, bf16 MXU operands, f32 accumulation / element-wise math)."""
    f32, bf16 = jnp.float32, jnp.bfloat16

    def lin(name, v, on_mxu=True):
        w, b = params[name]
        if not mirror_kernel_precision:
            return v @ w + b
        wq = w.astype(bf16)
        bq = b.astype(bf16).astype(f32)
        if on_mxu:
            return jnp.dot(v.astype(bf16), wq, preferred_element_type=f32) + bq
        return v @ wq.astype(f32) + bq   # tiny-K layers stay on the VPU in f32

    h = jax.nn.relu(lin("fc1", x))
    h = jax.nn.relu(lin("fc2", h))
    mu1, lv1 = lin("fc3_mu1", h), lin("fc3_logvar1", h)
    mu2, lv2 = lin("fc4_mu2", h), lin("fc4_logvar2", h)
    z = jnp.concatenate([mu1 + eps1 * jnp.exp(0.5 * lv1),
                         mu2 + eps2 * jnp.exp(0.5 * lv2)], axis=1)
    gate = jax.nn.sigmoid(lin("attn2", jax.nn.relu(lin("attn1", z, on_mxu=False))))
    zg = z * gate
    d = jax.nn.relu(lin("fc5", zg, on_mxu=False))
    d = jax.nn.relu(lin("fc6", d))
    recon = jax.nn.sigmoid(lin("fc7", d))
    kl_w = jnp.mean(jax.nn.sigmoid(
        lin("aux2", jax.nn.relu(lin("aux1", zg, on_mxu=False)), on_mxu=False)))
    return recon, mu1, lv1, mu2, lv2, kl_w


if __name__ == "__main__":
    key = jax.random.PRNGKey(0)
    k_param, k_x, k_e1, k_e2 = jax.random.split(key, 4)

    params = init_hicvae_params(k_param, INPUT_DIM, LATENT_DIM)
    param_slab = prepare_param_slab(params, INPUT_DIM, LATENT_DIM)   # packed once

    x = jax.random.uniform(k_x, (BATCH, INPUT_DIM), jnp.float32)     # BCE-range data
    eps1 = jax.random.normal(k_e1, (BATCH, LATENT_DIM), jnp.float32) # torch.randn_like noise
    eps2 = jax.random.normal(k_e2, (BATCH, LATENT_DIM), jnp.float32)

    outs = hicvae_forward(param_slab, x, eps1, eps2,
                          input_dim=INPUT_DIM, latent_dim=LATENT_DIM)
    outs = jax.block_until_ready(outs)
    recon, mu1, logvar1, mu2, logvar2, kl_w = outs

    assert recon.shape == (BATCH, INPUT_DIM)
    assert mu1.shape == (BATCH, LATENT_DIM) and logvar1.shape == (BATCH, LATENT_DIM)
    assert mu2.shape == (BATCH, LATENT_DIM) and logvar2.shape == (BATCH, LATENT_DIM)
    assert kl_w.shape == ()
    for o in outs:
        assert bool(jnp.all(jnp.isfinite(o)))

    names = ("recon", "mu1", "logvar1", "mu2", "logvar2", "kl_w")

    # Tight check vs a reference that mirrors the kernel's bf16-weight numerics.
    ref_mirror = hicvae_reference(params, x, eps1, eps2, mirror_kernel_precision=True)
    for name, got, want in zip(names, outs, ref_mirror):
        assert bool(jnp.allclose(got, want, atol=1e-4, rtol=1e-4)), name

    # Loose sanity check vs the pure-f32 reference (bf16 quantization budget;
    # catches gross semantic errors only).
    ref_f32 = hicvae_reference(params, x, eps1, eps2, mirror_kernel_precision=False)
    for name, got, want in zip(names, outs, ref_f32):
        assert float(jnp.max(jnp.abs(got - want))) < 0.25, name

    print("KERNEL_OK")
</pallas_src>

<mosaic_0001>
module attributes {stable_mosaic.version = 11 : i64} {
  func.func @_hicvae_kernel(%arg0: memref<8x20xf32, #tpu.memory_space<vmem>>, %arg1: memref<496x128xbf16, #tpu.memory_space<vmem>>, %arg2: memref<8x128xf32, #tpu.memory_space<vmem>>) attributes {dimension_semantics = [], scalar_prefetch = 0 : i64, scratch_operands = 0 : i64, tpu.core_type = #tpu.core_type<tc>} {
    %c0 = arith.constant 0 : index
    %c0_0 = arith.constant 0 : index
    %0 = vector.load %arg0[%c0, %c0_0] : memref<8x20xf32, #tpu.memory_space<vmem>>, vector<8x20xf32>
    %1 = vector.extract_strided_slice %0 {offsets = [0, 0], sizes = [8, 16], strides = [1, 1]} : vector<8x20xf32> to vector<8x16xf32>
    %2 = vector.extract_strided_slice %0 {offsets = [0, 16], sizes = [8, 4], strides = [1, 1]} : vector<8x20xf32> to vector<8x4xf32>
    %3 = arith.truncf %1 : vector<8x16xf32> to vector<8x16xbf16>
    %c0_1 = arith.constant 0 : index
    %c0_2 = arith.constant 0 : index
    %4 = vector.load %arg1[%c0_1, %c0_2] : memref<496x128xbf16, #tpu.memory_space<vmem>>, vector<16x128xbf16>
    %cst = arith.constant dense<0.000000e+00> : vector<8x128xf32>
    %5 = tpu.matmul %3, %4, %cst {dimension_numbers = #tpu.dot_dimension_numbers<[1], [0], [0], [1], [0, 0, 1, 1], [], []>} : vector<8x16xbf16>, vector<16x128xbf16>, vector<8x128xf32> -> vector<8x128xf32>
    %c473 = arith.constant 473 : index
    %c0_3 = arith.constant 0 : index
    %6 = vector.load %arg1[%c473, %c0_3] : memref<496x128xbf16, #tpu.memory_space<vmem>>, vector<1x128xbf16>
    %7 = arith.extf %6 : vector<1x128xbf16> to vector<1x128xf32>
    %8 = vector.broadcast %7 : vector<1x128xf32> to vector<8x128xf32>
    %9 = arith.addf %5, %8 : vector<8x128xf32>
    %cst_4 = arith.constant 0.000000e+00 : f32
    %10 = vector.broadcast %cst_4 : f32 to vector<8x128xf32>
    %11 = arith.maximumf %9, %10 : vector<8x128xf32>
    %12 = arith.truncf %11 : vector<8x128xf32> to vector<8x128xbf16>
    %c16 = arith.constant 16 : index
    %c0_5 = arith.constant 0 : index
    %13 = vector.load %arg1[%c16, %c0_5] : memref<496x128xbf16, #tpu.memory_space<vmem>>, vector<128x64xbf16>
    %cst_6 = arith.constant dense<0.000000e+00> : vector<8x64xf32>
    %14 = tpu.matmul %12, %13, %cst_6 {dimension_numbers = #tpu.dot_dimension_numbers<[1], [0], [0], [1], [0, 0, 1, 1], [], []>} : vector<8x128xbf16>, vector<128x64xbf16>, vector<8x64xf32> -> vector<8x64xf32>
    %c474 = arith.constant 474 : index
    %c0_7 = arith.constant 0 : index
    %15 = vector.load %arg1[%c474, %c0_7] : memref<496x128xbf16, #tpu.memory_space<vmem>>, vector<1x64xbf16>
    %16 = arith.extf %15 : vector<1x64xbf16> to vector<1x64xf32>
    %17 = vector.broadcast %16 : vector<1x64xf32> to vector<8x64xf32>
    %18 = arith.addf %14, %17 : vector<8x64xf32>
    %cst_8 = arith.constant 0.000000e+00 : f32
    %19 = vector.broadcast %cst_8 : f32 to vector<8x64xf32>
    %20 = arith.maximumf %18, %19 : vector<8x64xf32>
    %21 = arith.truncf %20 : vector<8x64xf32> to vector<8x64xbf16>
    %c144 = arith.constant 144 : index
    %c0_9 = arith.constant 0 : index
    %22 = vector.load %arg1[%c144, %c0_9] : memref<496x128xbf16, #tpu.memory_space<vmem>>, vector<64x128xbf16>
    %cst_10 = arith.constant dense<0.000000e+00> : vector<8x128xf32>
    %23 = tpu.matmul %21, %22, %cst_10 {dimension_numbers = #tpu.dot_dimension_numbers<[1], [0], [0], [1], [0, 0, 1, 1], [], []>} : vector<8x64xbf16>, vector<64x128xbf16>, vector<8x128xf32> -> vector<8x128xf32>
    %c475 = arith.constant 475 : index
    %c0_11 = arith.constant 0 : index
    %24 = vector.load %arg1[%c475, %c0_11] : memref<496x128xbf16, #tpu.memory_space<vmem>>, vector<1x128xbf16>
    %25 = arith.extf %24 : vector<1x128xbf16> to vector<1x128xf32>
    %26 = vector.broadcast %25 : vector<1x128xf32> to vector<8x128xf32>
    %27 = arith.addf %23, %26 : vector<8x128xf32>
    %28 = vector.extract_strided_slice %27 {offsets = [0, 16], sizes = [8, 4], strides = [1, 1]} : vector<8x128xf32> to vector<8x4xf32>
    %29 = vector.extract_strided_slice %27 {offsets = [0, 20], sizes = [8, 4], strides = [1, 1]} : vector<8x128xf32> to vector<8x4xf32>
    %cst_12 = arith.constant 5.000000e-01 : f32
    %30 = vector.broadcast %cst_12 : f32 to vector<8x4xf32>
    %31 = arith.mulf %30, %29 : vector<8x4xf32>
    %32 = math.exp %31 : vector<8x4xf32>
    %33 = arith.mulf %2, %32 : vector<8x4xf32>
    %34 = arith.addf %28, %33 : vector<8x4xf32>
    %c476 = arith.constant 476 : index
    %c0_13 = arith.constant 0 : index
    %35 = vector.load %arg1[%c476, %c0_13] : memref<496x128xbf16, #tpu.memory_space<vmem>>, vector<1x64xbf16>
    %36 = arith.extf %35 : vector<1x64xbf16> to vector<1x64xf32>
    %37 = vector.extract_strided_slice %34 {offsets = [0, 0], sizes = [8, 1], strides = [1, 1]} : vector<8x4xf32> to vector<8x1xf32>
    %c464 = arith.constant 464 : index
    %c0_14 = arith.constant 0 : index
    %38 = vector.load %arg1[%c464, %c0_14] : memref<496x128xbf16, #tpu.memory_space<vmem>>, vector<1x64xbf16>
    %39 = arith.extf %38 : vector<1x64xbf16> to vector<1x64xf32>
    %40 = vector.broadcast %37 : vector<8x1xf32> to vector<8x64xf32>
    %41 = vector.broadcast %39 : vector<1x64xf32> to vector<8x64xf32>
    %42 = arith.mulf %40, %41 : vector<8x64xf32>
    %43 = vector.broadcast %36 : vector<1x64xf32> to vector<8x64xf32>
    %44 = arith.addf %43, %42 : vector<8x64xf32>
    %45 = vector.extract_strided_slice %34 {offsets = [0, 1], sizes = [8, 1], strides = [1, 1]} : vector<8x4xf32> to vector<8x1xf32>
    %c465 = arith.constant 465 : index
    %c0_15 = arith.constant 0 : index
    %46 = vector.load %arg1[%c465, %c0_15] : memref<496x128xbf16, #tpu.memory_space<vmem>>, vector<1x64xbf16>
    %47 = arith.extf %46 : vector<1x64xbf16> to vector<1x64xf32>
    %48 = vector.broadcast %45 : vector<8x1xf32> to vector<8x64xf32>
    %49 = vector.broadcast %47 : vector<1x64xf32> to vector<8x64xf32>
    %50 = arith.mulf %48, %49 : vector<8x64xf32>
    %51 = arith.addf %44, %50 : vector<8x64xf32>
    %52 = vector.extract_strided_slice %34 {offsets = [0, 2], sizes = [8, 1], strides = [1, 1]} : vector<8x4xf32> to vector<8x1xf32>
    %c466 = arith.constant 466 : index
    %c0_16 = arith.constant 0 : index
    %53 = vector.load %arg1[%c466, %c0_16] : memref<496x128xbf16, #tpu.memory_space<vmem>>, vector<1x64xbf16>
    %54 = arith.extf %53 : vector<1x64xbf16> to vector<1x64xf32>
    %55 = vector.broadcast %52 : vector<8x1xf32> to vector<8x64xf32>
    %56 = vector.broadcast %54 : vector<1x64xf32> to vector<8x64xf32>
    %57 = arith.mulf %55, %56 : vector<8x64xf32>
    %58 = arith.addf %51, %57 : vector<8x64xf32>
    %59 = vector.extract_strided_slice %34 {offsets = [0, 3], sizes = [8, 1], strides = [1, 1]} : vector<8x4xf32> to vector<8x1xf32>
    %c467 = arith.constant 467 : index
    %c0_17 = arith.constant 0 : index
    %60 = vector.load %arg1[%c467, %c0_17] : memref<496x128xbf16, #tpu.memory_space<vmem>>, vector<1x64xbf16>
    %61 = arith.extf %60 : vector<1x64xbf16> to vector<1x64xf32>
    %62 = vector.broadcast %59 : vector<8x1xf32> to vector<8x64xf32>
    %63 = vector.broadcast %61 : vector<1x64xf32> to vector<8x64xf32>
    %64 = arith.mulf %62, %63 : vector<8x64xf32>
    %65 = arith.addf %58, %64 : vector<8x64xf32>
    %cst_18 = arith.constant 0.000000e+00 : f32
    %66 = vector.broadcast %cst_18 : f32 to vector<8x64xf32>
    %67 = arith.maximumf %65, %66 : vector<8x64xf32>
    %68 = arith.truncf %67 : vector<8x64xf32> to vector<8x64xbf16>
    %c208 = arith.constant 208 : index
    %c0_19 = arith.constant 0 : index
    %69 = vector.load %arg1[%c208, %c0_19] : memref<496x128xbf16, #tpu.memory_space<vmem>>, vector<64x4xbf16>
    %cst_20 = arith.constant dense<0.000000e+00> : vector<8x4xf32>
    %70 = tpu.matmul %68, %69, %cst_20 {dimension_numbers = #tpu.dot_dimension_numbers<[1], [0], [0], [1], [0, 0, 1, 1], [], []>} : vector<8x64xbf16>, vector<64x4xbf16>, vector<8x4xf32> -> vector<8x4xf32>
    %c477 = arith.constant 477 : index
    %c0_21 = arith.constant 0 : index
    %71 = vector.load %arg1[%c477, %c0_21] : memref<496x128xbf16, #tpu.memory_space<vmem>>, vector<1x4xbf16>
    %72 = arith.extf %71 : vector<1x4xbf16> to vector<1x4xf32>
    %73 = vector.broadcast %72 : vector<1x4xf32> to vector<8x4xf32>
    %74 = arith.addf %70, %73 : vector<8x4xf32>
    %cst_22 = arith.constant 0.000000e+00 : f32
    %75 = vector.broadcast %cst_22 : f32 to vector<8x4xf32>
    %76 = arith.subf %75, %74 : vector<8x4xf32>
    %77 = math.exp %76 : vector<8x4xf32>
    %cst_23 = arith.constant 1.000000e+00 : f32
    %78 = vector.broadcast %cst_23 : f32 to vector<8x4xf32>
    %79 = arith.addf %78, %77 : vector<8x4xf32>
    %cst_24 = arith.constant 1.000000e+00 : f32
    %80 = vector.broadcast %cst_24 : f32 to vector<8x4xf32>
    %81 = arith.divf %80, %79 : vector<8x4xf32>
    %82 = arith.mulf %34, %81 : vector<8x4xf32>
    %c478 = arith.constant 478 : index
    %c0_25 = arith.constant 0 : index
    %83 = vector.load %arg1[%c478, %c0_25] : memref<496x128xbf16, #tpu.memory_space<vmem>>, vector<1x96xbf16>
    %84 = arith.extf %83 : vector<1x96xbf16> to vector<1x96xf32>
    %85 = vector.extract_strided_slice %82 {offsets = [0, 0], sizes = [8, 1], strides = [1, 1]} : vector<8x4xf32> to vector<8x1xf32>
    %c468 = arith.constant 468 : index
    %c0_26 = arith.constant 0 : index
    %86 = vector.load %arg1[%c468, %c0_26] : memref<496x128xbf16, #tpu.memory_space<vmem>>, vector<1x96xbf16>
    %87 = arith.extf %86 : vector<1x96xbf16> to vector<1x96xf32>
    %88 = vector.broadcast %85 : vector<8x1xf32> to vector<8x96xf32>
    %89 = vector.broadcast %87 : vector<1x96xf32> to vector<8x96xf32>
    %90 = arith.mulf %88, %89 : vector<8x96xf32>
    %91 = vector.broadcast %84 : vector<1x96xf32> to vector<8x96xf32>
    %92 = arith.addf %91, %90 : vector<8x96xf32>
    %93 = vector.extract_strided_slice %82 {offsets = [0, 1], sizes = [8, 1], strides = [1, 1]} : vector<8x4xf32> to vector<8x1xf32>
    %c469 = arith.constant 469 : index
    %c0_27 = arith.constant 0 : index
    %94 = vector.load %arg1[%c469, %c0_27] : memref<496x128xbf16, #tpu.memory_space<vmem>>, vector<1x96xbf16>
    %95 = arith.extf %94 : vector<1x96xbf16> to vector<1x96xf32>
    %96 = vector.broadcast %93 : vector<8x1xf32> to vector<8x96xf32>
    %97 = vector.broadcast %95 : vector<1x96xf32> to vector<8x96xf32>
    %98 = arith.mulf %96, %97 : vector<8x96xf32>
    %99 = arith.addf %92, %98 : vector<8x96xf32>
    %100 = vector.extract_strided_slice %82 {offsets = [0, 2], sizes = [8, 1], strides = [1, 1]} : vector<8x4xf32> to vector<8x1xf32>
    %c470 = arith.constant 470 : index
    %c0_28 = arith.constant 0 : index
    %101 = vector.load %arg1[%c470, %c0_28] : memref<496x128xbf16, #tpu.memory_space<vmem>>, vector<1x96xbf16>
    %102 = arith.extf %101 : vector<1x96xbf16> to vector<1x96xf32>
    %103 = vector.broadcast %100 : vector<8x1xf32> to vector<8x96xf32>
    %104 = vector.broadcast %102 : vector<1x96xf32> to vector<8x96xf32>
    %105 = arith.mulf %103, %104 : vector<8x96xf32>
    %106 = arith.addf %99, %105 : vector<8x96xf32>
    %107 = vector.extract_strided_slice %82 {offsets = [0, 3], sizes = [8, 1], strides = [1, 1]} : vector<8x4xf32> to vector<8x1xf32>
    %c471 = arith.constant 471 : index
    %c0_29 = arith.constant 0 : index
    %108 = vector.load %arg1[%c471, %c0_29] : memref<496x128xbf16, #tpu.memory_space<vmem>>, vector<1x96xbf16>
    %109 = arith.extf %108 : vector<1x96xbf16> to vector<1x96xf32>
    %110 = vector.broadcast %107 : vector<8x1xf32> to vector<8x96xf32>
    %111 = vector.broadcast %109 : vector<1x96xf32> to vector<8x96xf32>
    %112 = arith.mulf %110, %111 : vector<8x96xf32>
    %113 = arith.addf %106, %112 : vector<8x96xf32>
    %cst_30 = arith.constant 0.000000e+00 : f32
    %114 = vector.broadcast %cst_30 : f32 to vector<8x96xf32>
    %115 = arith.maximumf %113, %114 : vector<8x96xf32>
    %116 = vector.extract_strided_slice %115 {offsets = [0, 0], sizes = [8, 64], strides = [1, 1]} : vector<8x96xf32> to vector<8x64xf32>
    %117 = vector.extract_strided_slice %115 {offsets = [0, 64], sizes = [8, 32], strides = [1, 1]} : vector<8x96xf32> to vector<8x32xf32>
    %c472 = arith.constant 472 : index
    %c0_31 = arith.constant 0 : index
    %118 = vector.load %arg1[%c472, %c0_31] : memref<496x128xbf16, #tpu.memory_space<vmem>>, vector<1x32xbf16>
    %119 = arith.extf %118 : vector<1x32xbf16> to vector<1x32xf32>
    %120 = vector.broadcast %119 : vector<1x32xf32> to vector<8x32xf32>
    %121 = arith.mulf %117, %120 : vector<8x32xf32>
    %cst_32 = arith.constant dense<0.000000e+00> : vector<8xf32>
    %122 = vector.multi_reduction <add>, %121, %cst_32 [1] : vector<8x32xf32> to vector<8xf32>
    %123 = vector.shape_cast %122 : vector<8xf32> to vector<8x1xf32>
    %c479 = arith.constant 479 : index
    %c0_33 = arith.constant 0 : index
    %124 = vector.load %arg1[%c479, %c0_33] : memref<496x128xbf16, #tpu.memory_space<vmem>>, vector<1x1xbf16>
    %125 = arith.extf %124 : vector<1x1xbf16> to vector<1x1xf32>
    %126 = vector.broadcast %125 : vector<1x1xf32> to vector<8x1xf32>
    %127 = arith.addf %123, %126 : vector<8x1xf32>
    %cst_34 = arith.constant 0.000000e+00 : f32
    %128 = vector.broadcast %cst_34 : f32 to vector<8x1xf32>
    %129 = arith.subf %128, %127 : vector<8x1xf32>
    %130 = math.exp %129 : vector<8x1xf32>
    %cst_35 = arith.constant 1.000000e+00 : f32
    %131 = vector.broadcast %cst_35 : f32 to vector<8x1xf32>
    %132 = arith.addf %131, %130 : vector<8x1xf32>
    %cst_36 = arith.constant 1.000000e+00 : f32
    %133 = vector.broadcast %cst_36 : f32 to vector<8x1xf32>
    %134 = arith.divf %133, %132 : vector<8x1xf32>
    %cst_37 = arith.constant dense<0.000000e+00> : vector<1xf32>
    %135 = vector.multi_reduction <add>, %134, %cst_37 [0] : vector<8x1xf32> to vector<1xf32>
    %136 = vector.shape_cast %135 : vector<1xf32> to vector<1x1xf32>
    %cst_38 = arith.constant 1.250000e-01 : f32
    %137 = vector.broadcast %cst_38 : f32 to vector<1x1xf32>
    %138 = arith.mulf %136, %137 : vector<1x1xf32>
    %139 = arith.truncf %116 : vector<8x64xf32> to vector<8x64xbf16>
    %c272 = arith.constant 272 : index
    %c0_39 = arith.constant 0 : index
    %140 = vector.load %arg1[%c272, %c0_39] : memref<496x128xbf16, #tpu.memory_space<vmem>>, vector<64x128xbf16>
    %cst_40 = arith.constant dense<0.000000e+00> : vector<8x128xf32>
    %141 = tpu.matmul %139, %140, %cst_40 {dimension_numbers = #tpu.dot_dimension_numbers<[1], [0], [0], [1], [0, 0, 1, 1], [], []>} : vector<8x64xbf16>, vector<64x128xbf16>, vector<8x128xf32> -> vector<8x128xf32>
    %c480 = arith.constant 480 : index
    %c0_41 = arith.constant 0 : index
    %142 = vector.load %arg1[%c480, %c0_41] : memref<496x128xbf16, #tpu.memory_space<vmem>>, vector<1x128xbf16>
    %143 = arith.extf %142 : vector<1x128xbf16> to vector<1x128xf32>
    %144 = vector.broadcast %143 : vector<1x128xf32> to vector<8x128xf32>
    %145 = arith.addf %141, %144 : vector<8x128xf32>
    %cst_42 = arith.constant 0.000000e+00 : f32
    %146 = vector.broadcast %cst_42 : f32 to vector<8x128xf32>
    %147 = arith.maximumf %145, %146 : vector<8x128xf32>
    %148 = arith.truncf %147 : vector<8x128xf32> to vector<8x128xbf16>
    %c336 = arith.constant 336 : index
    %c0_43 = arith.constant 0 : index
    %149 = vector.load %arg1[%c336, %c0_43] : memref<496x128xbf16, #tpu.memory_space<vmem>>, vector<128x128xbf16>
    %cst_44 = arith.constant dense<0.000000e+00> : vector<8x128xf32>
    %150 = tpu.matmul %148, %149, %cst_44 {dimension_numbers = #tpu.dot_dimension_numbers<[1], [0], [0], [1], [0, 0, 1, 1], [], []>} : vector<8x128xbf16>, vector<128x128xbf16>, vector<8x128xf32> -> vector<8x128xf32>
    %c481 = arith.constant 481 : index
    %c0_45 = arith.constant 0 : index
    %151 = vector.load %arg1[%c481, %c0_45] : memref<496x128xbf16, #tpu.memory_space<vmem>>, vector<1x128xbf16>
    %152 = arith.extf %151 : vector<1x128xbf16> to vector<1x128xf32>
    %153 = vector.broadcast %152 : vector<1x128xf32> to vector<8x128xf32>
    %154 = arith.addf %150, %153 : vector<8x128xf32>
    %cst_46 = arith.constant 0.000000e+00 : f32
    %155 = vector.broadcast %cst_46 : f32 to vector<8x128xf32>
    %156 = arith.subf %155, %154 : vector<8x128xf32>
    %157 = math.exp %156 : vector<8x128xf32>
    %cst_47 = arith.constant 1.000000e+00 : f32
    %158 = vector.broadcast %cst_47 : f32 to vector<8x128xf32>
    %159 = arith.addf %158, %157 : vector<8x128xf32>
    %cst_48 = arith.constant 1.000000e+00 : f32
    %160 = vector.broadcast %cst_48 : f32 to vector<8x128xf32>
    %161 = arith.divf %160, %159 : vector<8x128xf32>
    %162 = tpu.iota {dimensions = array<i32: 1>} : vector<8x128xi32>
    %c16_i32 = arith.constant 16 : i32
    %163 = vector.broadcast %c16_i32 : i32 to vector<8x128xi32>
    %164 = arith.cmpi slt, %162, %163 : vector<8x128xi32>
    %cst_49 = arith.constant 0.000000e+00 : f32
    %165 = vector.broadcast %cst_49 : f32 to vector<8x128xf32>
    %166 = arith.select %164, %161, %165 : vector<8x128xi1>, vector<8x128xf32>
    %167 = arith.addf %166, %27 : vector<8x128xf32>
    %c24_i32 = arith.constant 24 : i32
    %168 = vector.broadcast %c24_i32 : i32 to vector<8x128xi32>
    %169 = arith.cmpi eq, %162, %168 : vector<8x128xi32>
    %170 = vector.shape_cast %138 : vector<1x1xf32> to vector<1x1xf32>
    %171 = vector.broadcast %170 : vector<1x1xf32> to vector<8x128xf32>
    %cst_50 = arith.constant 0.000000e+00 : f32
    %172 = vector.broadcast %cst_50 : f32 to vector<8x128xf32>
    %173 = arith.select %169, %171, %172 : vector<8x128xi1>, vector<8x128xf32>
    %174 = arith.addf %167, %173 : vector<8x128xf32>
    %c0_51 = arith.constant 0 : index
    %c0_52 = arith.constant 0 : index
    %175 = vector.load %arg2[%c0_51, %c0_52] : memref<8x128xf32, #tpu.memory_space<vmem>>, vector<8x128xf32>
    tpu.vector_store %arg2[%c0_51, %c0_52], %174 {strides = array<i32>} : memref<8x128xf32, #tpu.memory_space<vmem>>, vector<8x128xf32>,
    return
  }
}

</mosaic_0001>

<bundles_post_ra>
// kernel: hicvae_forward.1
= control target key start
LH: loop header
LB: loop body
LE: loop exit
PB: predicated region body
PF: predicated region fallthrough
CT: control target
= control target key end

     0   :  { %7 = vsyncpa [#allocation3], 0  ;;  %s977_s9 = smov [#allocation2]   ;;  %s1135_s0 = inlined_call_operand.vmem [shape: f32[8,20], index: 0, kind: input, shape index: {}]   ;;  %s1136_s1 = inlined_call_operand.hbm [shape: bf16[496,128], index: 1, kind: input, shape index: {}]   ;;  %s1137_s2 = inlined_call_operand.vmem [shape: f32[8,128], index: 2, kind: output, shape index: {}]  }
   0x1   :  { %s15_s10 = sshll.u32 %s977_s9, 4  ;;  %s953_s13 = scalar_lea.hbm %s1136_s1, 3968  ;;  %s16_s10 = int_to_ptr.vmem [resolvable:$true] %s15_s10 }
   0x2   :  { %p954_p0 = scmp.ne.s32.totalorder %s1136_s1, %s953_s13  ;;  %p957_p1 = scmp.lt.u32.totalorder %s953_s13, %s1136_s1 }
   0x4   :  { %p959_p2 = pnand %p957_p1, %p954_p0 }
   0x6   :  { %962 = shalt.err (!%p959_p2)
}
   0x7   :  { %s963_s18 = scalar_lea.vmem %s16_s10, 3968  ;;  %p968_p4 = scmp.lt.s32.totalorder %s16_s10, %s16_s10 }
   0x8   :  { %p964_p3 = scmp.ne.s32.totalorder %s16_s10, %s963_s18  ;;  %p969_p5 = scmp.lt.s32.totalorder %s963_s18, %s963_s18 }
   0xa   :  { %p970_p6 = por %p969_p5, %p968_p4 }
   0xc   :  { %p971_p7 = pnand %p970_p6, %p964_p3 }
   0xe   :  { %974 = shalt.err (!%p971_p7)
}
   0xf   :  { %s978_s19 = smov 64   ;;  %s979_s20 = smov 4  }
  0x10   :  { %21 = dma.hbm_to_vmem [thread:$0]  %s1136_s1, 3968, %s16_s10, [#allocation3], %s978_s19, %s978_s19, %s979_s20  }
  0x11   :  { %975 = dma.done.wait [#allocation3], 3968  }
  0x12   :  { %976 = vsyncadd [#allocation3], 4294963328  ;;  %v980_v0 = vmov 0.0   ;;  %vm981_vm0 = vmmov 0   ;;  %v910_v1 = vld [vmem:[#allocation2] sm:$0xff]   ;;  %vm42_vm1 = vcmask 130048   ;;  %v32_v14 = vlaneseq }
  0x13   :  { %806 = vmatprep.subr.bf16.mxu1 %v980_v0  ;;  %808 = vmatprep.mubr.msk.bf16.mxu1 %vm981_vm0, %v980_v0  ;;  %v1027_v2 = vld [vmem:[%s1135_s0] sm:$0xff]  ;;  %v911_v4 = vld [vmem:[#allocation2 + $0x8] sm:$0xff]   ;;  %v912_v5 = vld [vmem:[#allocation2 + $0x10] sm:$0xff]   ;;  %vm236_vm2 = vcmask 523264   ;;  %v982_v49 = vmov 17   ;;  %v983_v50 = vmov 16  }
  0x14   :  { %832 = vmatprep.subr.bf16.mxu0 %v980_v0  ;;  %840 = vmatprep.mubr.msk.bf16.mxu0 %vm981_vm0, %v980_v0  ;;  %v27_v3 = vpack.c.bf16 %v1027_v2, %v1027_v2  ;;  %v913_v6 = vld [vmem:[#allocation2 + $0x18] sm:$0xff]   ;;  %v914_v7 = vld [vmem:[#allocation2 + $0x20] sm:$0xff]   ;;  %v915_v8 = vld [vmem:[#allocation2 + $0x28] sm:$0xff]   ;;  %v1045_v15 = vshrl.u32 %v32_v14, 7  ;;  %s984_s0 = smov 124   ;;  %v985_v56 = vmov 18  }
  0x15   :  { %807 = vmatpush3.bf16.msra.mxu1 %v910_v1  ;;  %v916_v9 = vld [vmem:[#allocation2 + $0x30] sm:$0xff]   ;;  %v917_v10 = vld [vmem:[#allocation2 + $0x38] sm:$0xff]   ;;  %v918_v11 = vld [vmem:[#allocation2 + $0x40] sm:$0xff]   ;;  %901 = vset.pattern.permute.xlu1 %v982_v49  ;;  %v986_v58 = vmov 19   ;;  %s987_s1 = smov 16   ;;  %vm497_vm3 = vcmask 261120  }
  0x16   :  { %812 = vmatprep.subr.bf16.mxu1 %v980_v0  ;;  %v919_v12 = vld [vmem:[#allocation2 + $0x48] sm:$0xff]   ;;  %v920_v13 = vld [vmem:[#allocation2 + $0x50] sm:$0xff]   ;;  %v1051_v18 = vsub.s32 1, %v1045_v15  ;;  %v921_v27 = vld [vmem:[#allocation2 + $0x58] sm:$0xff]   ;;  %v108_v31 = vsub.s32 2, %v1045_v15  ;;  %v210_v40 = vsub.s32 3, %v1045_v15  ;;  %900 = vset.pattern.permute.xlu0 %v983_v50 }
  0x17   :  { %833 = vmatpush3.bf16.msra.mxu0 %v919_v12  ;;  %v1047_v16 = vld [vmem:[#allocation2 + $0xec] sm:$0x1]  ;;  %v922_v28 = vld [vmem:[#allocation2 + $0x60] sm:$0xff]   ;;  %v104_v29 = vld [vmem:[#allocation2 + $0xec] sm:$0x2]  ;;  %v1085_v1 = vsub.s32 0, %v1045_v15 }
  0x18   :  { %809 = vmatmul.mubr.msk.bf16.vlgmr.msra.gmra.mrb[0].mxu1 %vm42_vm1, %v27_v3  ;;  %834 = vmatprep.subr.bf16.mxu0 %v980_v0  ;;  %v31_v17 = vunpack.c.l.bf16 %v1047_v16  ;;  %v105_v30 = vunpack.c.l.bf16 %v104_v29  ;;  %v923_v55 = vld [vmem:[#allocation2 + $0x68] sm:$0xff]   ;;  %v924_v57 = vld [vmem:[#allocation2 + $0x70] sm:$0xff]   ;;  %v925_v59 = vld [vmem:[#allocation2 + $0x78] sm:$0xff]   ;;  %v305_v3 = vsub.s32 4, %v1045_v15  ;;  %vm512_vm4 = vcmask 7168  }
  0x19   :  { %813 = vmatpush3.bf16.msra.mxu1 %v911_v4  ;;  %828 = vmatprep.mubr.msk.bf16.mxu1 %vm981_vm0, %v980_v0  ;;  %v926_v60 = vld [vmem:[#allocation2 + $0x80] sm:$0xff]   ;;  %v291_v61 = vld [vmem:[#allocation2 + $0xe8] sm:$0x1]  ;;  %v289_v62 = vld [vmem:[#allocation2 + $0xec] sm:$0x4] }
  0x1a   :  { %814 = vmatprep.subr.bf16.mxu1 %v980_v0  ;;  %v35_v19 = vrot.slane %v31_v17, %v1051_v18  ;;  %v109_v32 = vrot.slane %v105_v30, %v108_v31  ;;  %v211_v41 = vrot.slane %v105_v30, %v210_v40  ;;  %v292_v63 = vunpack.c.l.bf16 %v291_v61  ;;  %v318_v4 = vld [vmem:[#allocation2 + $0xe8] sm:$0x2]  ;;  %v930_v16 = vld [vmem:[#allocation2 + $0xa0] sm:$0xff]  }
  0x1b   :  { %835 = vmatpush3.bf16.msra.mxu0 %v920_v13  ;;  %v352_v30 = vsub.s32 5, %v1045_v15 }
  0x1c   :  { %836 = vmatprep.subr.bf16.mxu0 %v980_v0 }
  0x1d   :  { %815 = vmatpush3.bf16.msra.mxu1 %v912_v5  ;;  %v301_v5 = vrot.slane %v292_v63, %v1085_v1 }
  0x1e   :  { %816 = vmatprep.subr.bf16.mxu1 %v980_v0 }
  0x1f   :  { %837 = vmatpush3.bf16.msra.mxu0 %v921_v27 }
  0x20   :  { %838 = vmatprep.subr.bf16.mxu0 %v980_v0 }
  0x21   :  { %817 = vmatpush3.bf16.msra.mxu1 %v913_v6 }
  0x22   :  { %818 = vmatprep.subr.bf16.mxu1 %v980_v0 }
  0x23   :  { %839 = vmatpush3.bf16.msra.mxu0 %v922_v28 }
  0x24   :  { %844 = vmatprep.subr.bf16.mxu0 %v980_v0 }
  0x25   :  { %819 = vmatpush3.bf16.msra.mxu1 %v914_v7  ;;  %v319_v7 = vunpack.c.l.bf16 %v318_v4 }
  0x26   :  { %820 = vmatprep.subr.bf16.mxu1 %v980_v0 }
  0x27   :  { %v327_v13 = vrot.slane %v319_v7, %v108_v31 }
  0x29   :  { %821 = vmatpush3.bf16.msra.mxu1 %v915_v8 }
  0x2a   :  { %822 = vmatprep.subr.bf16.mxu1 %v980_v0 }
  0x2d   :  { %823 = vmatpush3.bf16.msra.mxu1 %v916_v9 }
  0x2e   :  { %824 = vmatprep.subr.bf16.mxu1 %v980_v0 }
  0x31   :  { %825 = vmatpush3.bf16.msra.mxu1 %v917_v10  ;;  %v315_v10 = vrot.slane %v292_v63, %v1051_v18  ;;  %v479_v63 = vsub.s32 7, %v1045_v15 }
  0x32   :  { %826 = vmatprep.subr.bf16.mxu1 %v980_v0 }
  0x35   :  { %827 = vmatpush3.bf16.msra.mxu1 %v918_v11 }
  0x36   :  { %856 = vmatprep.subr.bf16.mxu1 %v980_v0 }
  0xeb   :  { %v80_v20 = vpop.f32.mrb[0].mxu1 }
  0xec   :  { %v81_v21 = vadd.f32 %v80_v20, %v35_v19  ;;  %v810_v22 = vpop.f32.mrb[1].mxu1 }
  0xed   :  { %v83_v23 = vpop.f32.mrb[2].mxu1 }
  0xee   :  { %v86_v24 = vmax.f32 %v81_v21, 0.0  ;;  %v811_v25 = vpop.f32.mrb[3].mxu1  ;;  %v337_v23 = vrot.slane %v319_v7, %v210_v40 }
  0xf0   :  { %v87_v26 = vpack.c.bf16 %v86_v24, %v86_v24 }
  0xf2   :  { %829 = vmatmul.mubr.bf16.vlgmr.msra.gmra.mrb[4].mxu1 %v87_v26 }
  0xf3   :  { %864 = vmatprep.mubr.msk.bf16.mxu1 %vm981_vm0, %v980_v0 }
 0x1c5   :  { %v192_v33 = vpop.f32.mrb[4].mxu1 }
 0x1c6   :  { %v193_v34 = vadd.f32 %v192_v33, %v109_v32  ;;  %v830_v35 = vpop.f32.mrb[5].mxu1 }
 0x1c7   :  { %v195_v36 = vpop.f32.mrb[6].mxu1 }
 0x1c8   :  { %v198_v37 = vmax.f32 %v193_v34, 0.0  ;;  %v831_v38 = vpop.f32.mrb[7].mxu1 }
 0x1ca   :  { %v199_v39 = vpack.c.bf16 %v198_v37, %v198_v37 }
 0x1cc   :  { %841 = vmatmul.mubr.msk.bf16.vlgmr.msra.gmra.mrb[0].mxu0 %vm236_vm2, %v199_v39 }
 0x1cd   :  { %852 = vmatprep.mubr.msk.bf16.mxu0 %vm981_vm0, %v980_v0  ;;  %845 = vmatpush3.bf16.msra.mxu0 %v923_v55 }
 0x1ce   :  { %846 = vmatprep.subr.bf16.mxu0 %v980_v0 }
 0x1d1   :  { %847 = vmatpush3.bf16.msra.mxu0 %v924_v57 }
 0x1d2   :  { %848 = vmatprep.subr.bf16.mxu0 %v980_v0 }
 0x1d5   :  { %849 = vmatpush3.bf16.msra.mxu0 %v925_v59 }
 0x1d6   :  { %850 = vmatprep.subr.bf16.mxu0 %v980_v0 }
 0x1d9   :  { %851 = vmatpush3.bf16.msra.mxu0 %v926_v60 }
 0x1da   :  { %868 = vmatprep.subr.bf16.mxu0 %v980_v0 }
 0x29f   :  { %v274_v42 = vpop.f32.mrb[0].mxu0 }
 0x2a0   :  { %v1067_v43 = vadd.f32 %v274_v42, %v211_v41  ;;  %v842_v44 = vpop.f32.mrb[1].mxu0 }
 0x2a1   :  { %v277_v45 = vpop.f32.mrb[2].mxu0 }
 0x2a2   :  { %v280_v46 = vmul.f32 0.5, %v1067_v43  ;;  %v843_v47 = vpop.f32.mrb[3].mxu0  ;;  %v487_v45 = vrot.slane %v31_v17, %v1085_v1  ;;  %v434_v17 = vld [vmem:[#allocation2 + $0xe8] sm:$0x4] }
 0x2a3   :  { %v928_v47 = vld [vmem:[#allocation2 + $0x90] sm:$0xff]  }
 0x2a4   :  { %v281_v48 = vmul.f32 1.442695, %v280_v46  ;;  %v927_v46 = vld [vmem:[#allocation2 + $0x88] sm:$0xff]  }
 0x2a5   :  { %857 = vmatpush3.bf16.msra.mxu1 %v927_v46 }
 0x2a6   :  { %939 = vpow2.f32 %v281_v48  ;;  %858 = vmatprep.subr.bf16.mxu1 %v980_v0  ;;  %v929_v48 = vld [vmem:[#allocation2 + $0x98] sm:$0xff]  }
 0x2a9   :  { %859 = vmatpush3.bf16.msra.mxu1 %v928_v47 }
 0x2aa   :  { %860 = vmatprep.subr.bf16.mxu1 %v980_v0 }
 0x2ad   :  { %861 = vmatpush3.bf16.msra.mxu1 %v929_v48 }
 0x2ae   :  { %862 = vmatprep.subr.bf16.mxu1 %v980_v0 }
 0x2b0   :  { %v940_v51 = vpop.eup %939 }
 0x2b1   :  { %284 = vrot.lane.b32.xlu0 %v940_v51, %s984_s0  ;;  %863 = vmatpush3.bf16.msra.mxu1 %v930_v16 }
 0x323   :  { %v285_v52 = vpop.permute.xlu0 %284 }
 0x324   :  { %v287_v53 = vmul.f32 %v285_v52, %v1027_v2  ;;  %v290_v2 = vunpack.c.l.bf16 %v289_v62  ;;  %v448_v52 = vsub.s32 6, %v1045_v15 }
 0x326   :  { %v1072_v54 = vadd.f32 %v287_v53, %v1067_v43  ;;  %v306_v6 = vrot.slane %v290_v2, %v305_v3  ;;  %v353_v32 = vrot.slane %v290_v2, %v352_v30  ;;  %v461_v53 = vld [vmem:[#allocation2 + $0xe8] sm:$0x8] }
 0x328   :  { %309 = vperm.xlu1 %901, %v1072_v54   ;;  %295 = vperm.xlu0 %900, %v1072_v54  }
 0x32c   :  { %902 = vset.pattern.permute.xlu1 %v985_v56  ;;  %905 = vset.pattern.permute.xlu0 %v982_v49  ;;  %v1108_v49 = vld [vmem:[#allocation2 + $0xec] sm:$0x8] }
 0x32d   :  { %321 = vperm.xlu1 %902, %v1072_v54   ;;  %v433_v51 = vunpack.c.l.bf16 %v1108_v49 }
 0x32f   :  { %v449_v55 = vrot.slane %v433_v51, %v448_v52 }
 0x331   :  { %903 = vset.pattern.permute.xlu1 %v986_v58 }
 0x332   :  { %331 = vperm.xlu1 %903, %v1072_v54  }
 0x336   :  { %904 = vset.pattern.permute.xlu1 %v983_v50  ;;  %v435_v50 = vunpack.c.l.bf16 %v434_v17 }
 0x3a7   :  { %v310_v8 = vpop.permute.xlu1 %309  ;;  %v296_v9 = vpop.permute.xlu0 %295 }
 0x3a8   :  { %v302_v11 = vmul.f32 %v301_v5, %v296_v9  ;;  %v316_v19 = vmul.f32 %v315_v10, %v310_v8  ;;  %v931_v8 = vld [vmem:[#allocation2 + $0xa8] sm:$0xff]  }
 0x3aa   :  { %v307_v12 = vadd.f32 %v306_v6, %v302_v11 }
 0x3ac   :  { %v322_v20 = vpop.permute.xlu1 %321  ;;  %v317_v21 = vadd.f32 %v316_v19, %v307_v12 }
 0x3ad   :  { %v328_v22 = vmul.f32 %v327_v13, %v322_v20  ;;  %v933_v13 = vld [vmem:[#allocation2 + $0xb8] sm:$0xff]  }
 0x3af   :  { %v329_v25 = vadd.f32 %v328_v22, %v317_v21  ;;  %v934_v22 = vld [vmem:[#allocation2 + $0xc0] sm:$0xff]  }
 0x3b1   :  { %v332_v24 = vpop.permute.xlu1 %331 }
 0x3b2   :  { %v338_v26 = vmul.f32 %v337_v23, %v332_v24  ;;  %v935_v23 = vld [vmem:[#allocation2 + $0xc8] sm:$0xff]   ;;  %v936_v24 = vld [vmem:[#allocation2 + $0xd0] sm:$0xff]  }
 0x3b4   :  { %v339_v27 = vadd.f32 %v338_v26, %v329_v25  ;;  %v937_v25 = vld [vmem:[#allocation2 + $0xd8] sm:$0xff]   ;;  %v938_v26 = vld [vmem:[#allocation2 + $0xe0] sm:$0xff]  }
 0x3b6   :  { %v340_v28 = vmax.f32 %v339_v27, 0.0 }
 0x3b8   :  { %v341_v29 = vpack.c.bf16 %v340_v28, %v340_v28 }
 0x3ba   :  { %853 = vmatmul.mubr.msk.bf16.vlgmr.msra.gmra.mrb[4].mxu0 %vm236_vm2, %v341_v29  ;;  %v988_v29 = vmov 0  }
 0x3bb   :  { %884 = vmatprep.mubr.msk.bf16.mxu0 %vm981_vm0, %v980_v0  ;;  %869 = vmatpush3.bf16.msra.mxu0 %v931_v8 }
 0x3bc   :  { %870 = vmatprep.subr.bf16.mxu0 %v980_v0 }
 0x48d   :  { %v415_v31 = vpop.f32.mrb[4].mxu0 }
 0x48e   :  { %v416_v33 = vadd.f32 %v415_v31, %v353_v32  ;;  %v854_v34 = vpop.f32.mrb[5].mxu0 }
 0x48f   :  { %v418_v35 = vpop.f32.mrb[6].mxu0 }
 0x490   :  { %v421_v36 = vsub.f32 0.0, %v416_v33  ;;  %v855_v37 = vpop.f32.mrb[7].mxu0 }
 0x492   :  { %v422_v38 = vmul.f32 1.442695, %v421_v36 }
 0x494   :  { %941 = vpow2.f32 %v422_v38 }
 0x49e   :  { %v942_v39 = vpop.eup %941 }
 0x49f   :  { %v424_v40 = vadd.f32 1.0, %v942_v39  ;;  %v504_v39 = vrot.slane %v433_v51, %v479_v63 }
 0x4a1   :  { %943 = vrcp.f32 %v424_v40 }
 0x4ab   :  { %v944_v41 = vpop.eup %943 }
 0x4ac   :  { %428 = vrot.lane.b32.xlu0 %v944_v41, %s987_s1 }
 0x51e   :  { %v429_v42 = vpop.permute.xlu0 %428 }
 0x51f   :  { %v431_v44 = vmul.f32 %v429_v42, %v1072_v54  ;;  %v444_v54 = vrot.slane %v435_v50, %v305_v3  ;;  %v932_v3 = vld [vmem:[#allocation2 + $0xb0] sm:$0xff]  }
 0x520   :  { %871 = vmatpush3.bf16.msra.mxu0 %v932_v3 }
 0x521   :  { %452 = vperm.xlu0 %905, %v431_v44   ;;  %438 = vperm.xlu1 %904, %v431_v44  }
 0x522   :  { %872 = vmatprep.subr.bf16.mxu0 %v980_v0 }
 0x524   :  { %873 = vmatpush3.bf16.msra.mxu0 %v933_v13 }
 0x525   :  { %906 = vset.pattern.permute.xlu1 %v985_v56  ;;  %489 = vrot.lane.b32.xlu0 %v487_v45, %s978_s19  ;;  %v462_v56 = vunpack.c.l.bf16 %v461_v53 }
 0x526   :  { %464 = vperm.xlu1 %906, %v431_v44   ;;  %874 = vmatprep.subr.bf16.mxu0 %v980_v0 }
 0x527   :  { %v470_v62 = vrot.slane %v462_v56, %v448_v52  ;;  %v480_v7 = vrot.slane %v462_v56, %v479_v63  ;;  %909 = vset.pattern.permute.xlu0 %v988_v29  ;;  %v720_v63 = vand.u32 127, %v32_v14 }
 0x528   :  { %875 = vmatpush3.bf16.msra.mxu0 %v934_v22 }
 0x529   :  { %876 = vmatprep.subr.bf16.mxu0 %v980_v0  ;;  %vm721_vm5 = vcmp.lt.s32.totalorder %v720_v63, 16  ;;  %vm724_vm6 = vcmp.eq.s32.totalorder %v720_v63, 24 }
 0x52a   :  { %907 = vset.pattern.permute.xlu1 %v986_v58  ;;  %v458_v58 = vrot.slane %v435_v50, %v352_v30  ;;  %v530_v30 = vld [vmem:[#allocation2 + $0xf0] sm:$0x1] }
 0x52b   :  { %474 = vperm.xlu1 %907, %v431_v44   ;;  %v531_v32 = vunpack.c.l.bf16 %v530_v30 }
 0x52c   :  { %877 = vmatpush3.bf16.msra.mxu0 %v935_v23 }
 0x52d   :  { %878 = vmatprep.subr.bf16.mxu0 %v980_v0  ;;  %v535_v31 = vrot.slane %v531_v32, %v1085_v1  ;;  %v624_v49 = vrot.slane %v531_v32, %v1051_v18 }
 0x52f   :  { %908 = vset.pattern.permute.xlu1 %v988_v29 }
 0x530   :  { %879 = vmatpush3.bf16.msra.mxu0 %v936_v24 }
 0x531   :  { %880 = vmatprep.subr.bf16.mxu0 %v980_v0 }
 0x534   :  { %881 = vmatpush3.bf16.msra.mxu0 %v937_v25 }
 0x535   :  { %882 = vmatprep.subr.bf16.mxu0 %v980_v0 }
 0x538   :  { %883 = vmatpush3.bf16.msra.mxu0 %v938_v26 }
 0x5a0   :  { %v439_v57 = vpop.permute.xlu1 %438  ;;  %v453_v60 = vpop.permute.xlu0 %452 }
 0x5a1   :  { %v445_v59 = vmul.f32 %v444_v54, %v439_v57  ;;  %v459_v2 = vmul.f32 %v458_v58, %v453_v60 }
 0x5a3   :  { %v450_v61 = vadd.f32 %v449_v55, %v445_v59 }
 0x5a4   :  { %v490_v19 = vpop.permute.xlu0 %489 }
 0x5a5   :  { %v465_v4 = vpop.permute.xlu1 %464  ;;  %v460_v5 = vadd.f32 %v459_v2, %v450_v61 }
 0x5a6   :  { %v471_v6 = vmul.f32 %v470_v62, %v465_v4 }
 0x5a8   :  { %v472_v10 = vadd.f32 %v471_v6, %v460_v5 }
 0x5aa   :  { %v475_v9 = vpop.permute.xlu1 %474 }
 0x5ab   :  { %v481_v11 = vmul.f32 %v480_v7, %v475_v9 }
 0x5ad   :  { %v482_v12 = vadd.f32 %v481_v11, %v472_v10 }
 0x5af   :  { %v483_v15 = vmax.f32 %v482_v12, 0.0 }
 0x5b1   :  { %v492_v20 = vmul.f32 %v490_v19, %v483_v15  ;;  %v521_v21 = vpack.c.bf16 %v483_v15, %v483_v15 }
 0x5b3   :  { %865 = vmatmul.mubr.msk.bf16.vlgmr.msra.gmra.mrb[8].mxu1 %vm236_vm2, %v521_v21  ;;  %494 = vrot.lane.b32.xlu1 %v492_v20, %s978_s19 }
 0x625   :  { %v495_v27 = vpop.permute.xlu1 %494 }
 0x626   :  { %v498_v28 = vsel %vm497_vm3, %v495_v27, 0.0 }
 0x627   :  { %499 = vadd.xlane.f32.xlu0 %v498_v28 }
 0x686   :  { %v597_v33 = vpop.f32.mrb[8].mxu1 }
 0x687   :  { %v598_v34 = vadd.f32 %v597_v33, %v535_v31  ;;  %v866_v35 = vpop.f32.mrb[9].mxu1 }
 0x688   :  { %v600_v36 = vpop.f32.mrb[10].mxu1 }
 0x689   :  { %v603_v37 = vmax.f32 %v598_v34, 0.0  ;;  %v867_v38 = vpop.f32.mrb[11].mxu1 }
 0x68b   :  { %v604_v0 = vpack.c.bf16 %v603_v37, %v603_v37 }
 0x68d   :  { %885 = vmatmul.mubr.bf16.vlgmr.msra.gmra.mrb[8].mxu0 %v604_v0 }
 0x6b4   :  { %v500_v40 = vpop.xlane.xlu0 %499 }
 0x6b5   :  { %v505_v41 = vadd.f32 %v504_v39, %v500_v40 }
 0x6b7   :  { %v506_v42 = vsub.f32 0.0, %v505_v41 }
 0x6b9   :  { %v507_v44 = vmul.f32 1.442695, %v506_v42 }
 0x6bb   :  { %945 = vpow2.f32 %v507_v44 }
 0x6c5   :  { %v946_v45 = vpop.eup %945 }
 0x6c6   :  { %v509_v46 = vadd.f32 1.0, %v946_v45 }
 0x6c8   :  { %947 = vrcp.f32 %v509_v46 }
 0x6d2   :  { %v948_v1 = vpop.eup %947 }
 0x6d3   :  { %v513_v47 = vsel %vm512_vm4, %v948_v1, 0.0 }
 0x6d4   :  { %v514_v48 = vrot.slane %v513_v47, 4 }
 0x6d6   :  { %v515_v16 = vadd.f32 %v514_v48, %v513_v47 }
 0x6d8   :  { %v516_v17 = vrot.slane %v515_v16, 2 }
 0x6da   :  { %v517_v50 = vadd.f32 %v516_v17, %v515_v16 }
 0x6dc   :  { %v518_v52 = vrot.slane %v517_v50, 1 }
 0x6de   :  { %v519_v53 = vadd.f32 %v518_v52, %v517_v50 }
 0x6e0   :  { %v520_v54 = vmul.f32 0.125, %v519_v53 }
 0x6e2   :  { %727 = vperm.xlu1 %908, %v520_v54  }
 0x760   :  { %v707_v51 = vpop.f32.mrb[8].mxu0 }
 0x761   :  { %v708_v55 = vadd.f32 %v707_v51, %v624_v49  ;;  %v886_v56 = vpop.f32.mrb[9].mxu0  ;;  %v728_v4 = vpop.permute.xlu1 %727 }
 0x762   :  { %v710_v57 = vpop.f32.mrb[10].mxu0  ;;  %v730_v6 = vsel %vm724_vm6, %v728_v4, 0.0 }
 0x763   :  { %v713_v58 = vsub.f32 0.0, %v708_v55  ;;  %v887_v59 = vpop.f32.mrb[11].mxu0 }
 0x765   :  { %v714_v60 = vmul.f32 1.442695, %v713_v58 }
 0x767   :  { %949 = vpow2.f32 %v714_v60 }
 0x771   :  { %v950_v61 = vpop.eup %949 }
 0x772   :  { %v716_v62 = vadd.f32 1.0, %v950_v61 }
 0x774   :  { %951 = vrcp.f32 %v716_v62 }
 0x77e   :  { %v952_v2 = vpop.eup %951 }
 0x77f   :  { %v722_v5 = vsel %vm721_vm5, %v952_v2, 0.0 }
 0x780   :  { %v723_v18 = vadd.f32 %v722_v5, %v1067_v43 }
 0x782   :  { %v731_v7 = vadd.f32 %v730_v6, %v723_v18 }
 0x784   :  { %732 = vst [vmem:[%s1137_s2] sm:$0xff] %v731_v7 }
 0x785   :  { %737 = vsyncpa [#allocation3], 1 }

</bundles_post_ra>
